<compile_context>
chip_gen: v7x
topology: tpu7x:2x2x1
jax: 0.10.0
libtpu: 0.0.40
codegen_flags: <defaults>
</compile_context>

<pallas_src>
import jax
import jax.numpy as jnp
from jax.experimental import pallas as pl
from jax.experimental.pallas import tpu as pltpu


def _round_up(x: int, m: int) -> int:
    return ((x + m - 1) // m) * m


def _patch_embed_kernel(x_ref, w_ref, b_ref, pos_ref, o_ref):
    """out = x @ W + bias + positions for one (gene-row tile, batch) grid step."""
    x = x_ref[0]                                   # (tile_g, C), native dtype -> MXU
    w = w_ref[...]                                 # (C, E), native dtype
    y = jnp.dot(x, w, preferred_element_type=jnp.float32)          # f32 accumulate
    y = y + b_ref[...].astype(jnp.float32) + pos_ref[...].astype(jnp.float32)
    o_ref[0] = y.astype(o_ref.dtype)


_TILE_VMEM_BUDGET = 24 * 1024 * 1024   # double-buffered streaming tiles (fits v7x 64 MiB)
_MAX_TILE_G = 2048


def patch_lin_position_embedding(x, w, b, positions):
    """x: (B, G, C) -> (B, G, E).  w: (C, E), b: (E,), positions: (G, E)."""
    B, G, C = x.shape
    C_w, E = w.shape
    assert C_w == C and b.shape == (E,) and positions.shape == (G, E)

    x_item = jnp.dtype(x.dtype).itemsize
    w_item = jnp.dtype(w.dtype).itemsize
    p_item = jnp.dtype(positions.dtype).itemsize
    o_item = x_item  # output dtype follows x

    # Lane-dense output: pad the embedding axis of W/bias/positions once
    # (weight-prep-sized, not activation-sized); slice E back only if padded.
    E_pad = _round_up(E, 128)
    if E_pad != E:
        w = jnp.pad(w, ((0, 0), (0, E_pad - E)))
        b = jnp.pad(b, ((0, E_pad - E),))
        positions = jnp.pad(positions, ((0, 0), (0, E_pad - E)))

    c_lanes = _round_up(C, 128)   # x tile's minor dim pads to 128 lanes in VMEM
    e_lanes = E_pad

    # Row-tile selection: as big as the double-buffered VMEM budget allows,
    # so each step's DMA is MiB-scale and the ~0.35us/step overhead amortizes.
    per_row = 2 * (c_lanes * x_item + e_lanes * p_item + e_lanes * o_item)
    max_rows = min(_MAX_TILE_G, max(8, (_TILE_VMEM_BUDGET // per_row) // 8 * 8))

    if G <= max_rows:
        tile_g, G_pad = G, G                      # single gene tile, no padding
    else:
        tile_g = None
        if G % 8 == 0:                            # prefer a tile that divides G exactly
            t = max_rows
            while t >= 8:
                if G % t == 0:
                    tile_g = t
                    break
                t -= 8
        if tile_g is None:                        # fallback: minimal row padding
            tile_g = max_rows
        G_pad = _round_up(G, tile_g)

    if G_pad != G:
        # TODO(synk): ragged last gene tile could use an in-kernel masked store
        # instead of this extra pad/slice HBM pass.
        x = jnp.pad(x, ((0, 0), (0, G_pad - G), (0, 0)))
        positions = jnp.pad(positions, ((0, G_pad - G), (0, 0)))

    b2d = b.reshape(1, E_pad)
    num_g_tiles = G_pad // tile_g

    # Real VMEM footprint (lane/sublane padded, per-operand itemsizes), 1.5x
    # headroom, kept strictly below v7x's 64 MiB physical VMEM.
    footprint = (
        2 * tile_g * c_lanes * x_item          # x tile, double-buffered
        + 2 * tile_g * e_lanes * p_item        # positions tile, double-buffered
        + 2 * tile_g * e_lanes * o_item        # out tile, double-buffered
        + 2 * _round_up(C, 8) * e_lanes * w_item   # resident W
        + 2 * 8 * e_lanes * w_item                 # bias
    )
    vmem_limit = int(min(max(int(footprint * 1.5), 16 * 1024 * 1024),
                         56 * 1024 * 1024))

    cost = pl.CostEstimate(
        flops=2 * B * G_pad * C * E_pad + 2 * B * G_pad * E_pad,
        transcendentals=0,
        bytes_accessed=(B * G_pad * C * x_item          # x read
                        + B * G_pad * E_pad * o_item    # out write
                        + G_pad * E_pad * p_item        # positions read once
                        + C * E_pad * w_item + E_pad * w_item),
    )

    out = pl.pallas_call(
        _patch_embed_kernel,
        out_shape=jax.ShapeDtypeStruct((B, G_pad, E_pad), x.dtype),
        grid_spec=pltpu.PrefetchScalarGridSpec(
            num_scalar_prefetch=0,
            # Gene tiles outer (megacore-sharded), batch innermost: the
            # positions block index is constant across the inner batch loop,
            # so it stays VMEM-resident instead of being re-DMA'd per batch.
            grid=(num_g_tiles, B),
            in_specs=[
                pl.BlockSpec((1, tile_g, C), lambda gi, bi: (bi, gi, 0)),    # x tile
                pl.BlockSpec((C, E_pad), lambda gi, bi: (0, 0)),             # W (resident)
                pl.BlockSpec((1, E_pad), lambda gi, bi: (0, 0)),             # bias (resident)
                pl.BlockSpec((tile_g, E_pad), lambda gi, bi: (gi, 0)),       # positions tile
            ],
            out_specs=pl.BlockSpec((1, tile_g, E_pad), lambda gi, bi: (bi, gi, 0)),
        ),
        compiler_params=pltpu.CompilerParams(
            dimension_semantics=("parallel", "arbitrary"),
            vmem_limit_bytes=vmem_limit,
        ),
        cost_estimate=cost,
    )(x, w, b2d, positions)

    if G_pad != G or E_pad != E:
        out = out[:, :G, :E]
    return out


def patch_lin_position_embedding_ref(x, w, b, positions):
    """Pure-JAX reference matching the PyTorch module forward."""
    return jnp.einsum("bgc,ce->bge", x, w) + b + positions


if __name__ == "__main__":
    # Small shapes consistent with the module: batch=2, in_channels=4,
    # gene_size=64, emb_size=128 (lane-dense last dim; no padding path taken).
    B, G, C, E = 2, 64, 4, 128

    key = jax.random.PRNGKey(0)
    kx, kw, kb, kp = jax.random.split(key, 4)

    x = jax.random.normal(kx, (B, G, C), dtype=jnp.float32)
    # nn.Linear weight is (E, C) in torch; stored here pre-transposed as (C, E).
    w = jax.random.normal(kw, (C, E), dtype=jnp.float32) * (1.0 / jnp.sqrt(C))
    b = jax.random.normal(kb, (E,), dtype=jnp.float32) * 0.01
    positions = jax.random.normal(kp, (G, E), dtype=jnp.float32)

    out = patch_lin_position_embedding(x, w, b, positions)
    out = jax.block_until_ready(out)

    ref = patch_lin_position_embedding_ref(x, w, b, positions)
    assert out.shape == (B, G, E) and out.dtype == x.dtype
    assert jnp.allclose(out, ref, atol=1e-5, rtol=1e-5), "mismatch vs reference"

    print("KERNEL_OK")
</pallas_src>

<mosaic_0001>
module attributes {stable_mosaic.version = 11 : i64} {
  func.func @_patch_embed_kernel(%arg0: i32, %arg1: i32, %arg2: memref<1x64x4xf32, #tpu.memory_space<vmem>>, %arg3: memref<4x128xf32, #tpu.memory_space<vmem>>, %arg4: memref<1x128xf32, #tpu.memory_space<vmem>>, %arg5: memref<64x128xf32, #tpu.memory_space<vmem>>, %arg6: memref<1x64x128xf32, #tpu.memory_space<vmem>>) attributes {dimension_semantics = [#tpu.dimension_semantics<parallel>, #tpu.dimension_semantics<arbitrary>], iteration_bounds = array<i64: 1, 2>, scalar_prefetch = 0 : i64, scratch_operands = 0 : i64, tpu.core_type = #tpu.core_type<tc>, window_params = [{transform_indices = @transform_0, window_bounds = array<i64: 1, 64, 4>}, {pipeline_mode = #tpu.pipeline_mode<synchronous>, transform_indices = @transform_1, window_bounds = array<i64: 4, 128>}, {pipeline_mode = #tpu.pipeline_mode<synchronous>, transform_indices = @transform_2, window_bounds = array<i64: 1, 128>}, {transform_indices = @transform_3, window_bounds = array<i64: 64, 128>}, {transform_indices = @transform_4, window_bounds = array<i64: 1, 64, 128>}]} {
    %c0 = arith.constant 0 : index
    %c0_0 = arith.constant 0 : index
    %c0_1 = arith.constant 0 : index
    %0 = vector.load %arg2[%c0, %c0_0, %c0_1] : memref<1x64x4xf32, #tpu.memory_space<vmem>>, vector<1x64x4xf32>
    %1 = vector.shape_cast %0 : vector<1x64x4xf32> to vector<64x4xf32>
    %c0_2 = arith.constant 0 : index
    %c0_3 = arith.constant 0 : index
    %2 = vector.load %arg3[%c0_2, %c0_3] : memref<4x128xf32, #tpu.memory_space<vmem>>, vector<4x128xf32>
    %cst = arith.constant dense<0.000000e+00> : vector<64x128xf32>
    %3 = tpu.matmul %1, %2, %cst {dimension_numbers = #tpu.dot_dimension_numbers<[1], [0], [0], [1], [0, 0, 1, 1], [], []>} : vector<64x4xf32>, vector<4x128xf32>, vector<64x128xf32> -> vector<64x128xf32>
    %c0_4 = arith.constant 0 : index
    %c0_5 = arith.constant 0 : index
    %4 = vector.load %arg4[%c0_4, %c0_5] : memref<1x128xf32, #tpu.memory_space<vmem>>, vector<1x128xf32>
    %5 = vector.broadcast %4 : vector<1x128xf32> to vector<64x128xf32>
    %6 = arith.addf %3, %5 : vector<64x128xf32>
    %c0_6 = arith.constant 0 : index
    %c0_7 = arith.constant 0 : index
    %7 = vector.load %arg5[%c0_6, %c0_7] : memref<64x128xf32, #tpu.memory_space<vmem>>, vector<64x128xf32>
    %8 = arith.addf %6, %7 : vector<64x128xf32>
    %c0_8 = arith.constant 0 : index
    %c0_9 = arith.constant 0 : index
    %c0_10 = arith.constant 0 : index
    %9 = vector.load %arg6[%c0_8, %c0_9, %c0_10] : memref<1x64x128xf32, #tpu.memory_space<vmem>>, vector<1x64x128xf32>
    %10 = vector.shape_cast %9 : vector<1x64x128xf32> to vector<64x128xf32>
    %11 = vector.shape_cast %8 : vector<64x128xf32> to vector<1x64x128xf32>
    tpu.vector_store %arg6[%c0_8, %c0_9, %c0_10], %11 {strides = array<i32>} : memref<1x64x128xf32, #tpu.memory_space<vmem>>, vector<1x64x128xf32>,
    return
  }
  func.func @transform_0(%arg0: i32, %arg1: i32) -> (i32, i32, i32) {
    %c0_i32 = arith.constant 0 : i32
    %c0_i32_0 = arith.constant 0 : i32
    return %arg1, %arg0, %c0_i32 : i32, i32, i32
  }
  func.func @transform_1(%arg0: i32, %arg1: i32) -> (i32, i32) {
    %c0_i32 = arith.constant 0 : i32
    %c0_i32_0 = arith.constant 0 : i32
    %c0_i32_1 = arith.constant 0 : i32
    return %c0_i32, %c0_i32_0 : i32, i32
  }
  func.func @transform_2(%arg0: i32, %arg1: i32) -> (i32, i32) {
    %c0_i32 = arith.constant 0 : i32
    %c0_i32_0 = arith.constant 0 : i32
    %c0_i32_1 = arith.constant 0 : i32
    return %c0_i32, %c0_i32_0 : i32, i32
  }
  func.func @transform_3(%arg0: i32, %arg1: i32) -> (i32, i32) {
    %c0_i32 = arith.constant 0 : i32
    %c0_i32_0 = arith.constant 0 : i32
    return %arg0, %c0_i32 : i32, i32
  }
  func.func @transform_4(%arg0: i32, %arg1: i32) -> (i32, i32, i32) {
    %c0_i32 = arith.constant 0 : i32
    %c0_i32_0 = arith.constant 0 : i32
    return %arg1, %arg0, %c0_i32 : i32, i32, i32
  }
}

</mosaic_0001>

<bundles_post_ra>
// kernel: tpu_custom_call.1
= control target key start
LH: loop header
LB: loop body
LE: loop exit
PB: predicated region body
PF: predicated region fallthrough
CT: control target
= control target key end

     0   :  { %9 = vsyncpa [#allocation3], 0  ;;  %s906_s0 = inlined_call_operand.vmem [shape: f32[2,64,4], index: 0, kind: input, shape index: {}]   ;;  %s907_s1 = inlined_call_operand.vmem [shape: f32[4,128], index: 1, kind: input, shape index: {}]   ;;  %s908_s2 = inlined_call_operand.vmem [shape: f32[1,128], index: 2, kind: input, shape index: {}]   ;;  %s909_s3 = inlined_call_operand.vmem [shape: f32[64,128], index: 3, kind: input, shape index: {}]   ;;  %s910_s4 = inlined_call_operand.hbm [shape: f32[2,64,128], index: 4, kind: output, shape index: {}]  }
   0x1   :  { %11 = vsyncpa [#allocation3 + $0x1], 0  ;;  %s749_s15 = smov 0   ;;  %s751_s16 = smov 0  }
   0x2   :  { %s753_s17 = smov 0   ;;  %s755_s18 = smov 0  }
   0x3   :  { %s757_s19 = smov 0   ;;  %s759_s20 = smov 0  }
   0x4 LB: > { %s533_s21 = sadd.s32 4294967295, %s719_s20   ;;  %s534_s22 = sadd.s32 4294967294, %s719_s20   ;;  %s719_s20 = sphi %s759_s20, %s17_s20   ;;  %s715_s19 = sphi %s757_s19, %s917_s19   ;;  %s711_s18 = sphi %s755_s18, %s916_s18   ;;  %s707_s17 = sphi %s753_s17, %s915_s17   ;;  %s703_s16 = sphi %s751_s16, %s914_s16   ;;  %s699_s15 = sphi %s749_s15, %s913_s15  }
   0x5   : > { %s26_s23 = sadd.s32 1, %s715_s19  ;;  %s134_s24 = sadd.s32 1, %s707_s17 }
   0x6   : > { %p27_p0 = scmp.ge.s32.totalorder %s26_s23, 2  ;;  %p144_p1 = scmp.ne.s32.totalorder %s707_s17, %s703_s16 }
   0x7   : > { %p145_p2 = scmp.eq.s32.totalorder %s533_s21, 1  ;;  %p150_p3 = scmp.ne.s32.totalorder %s703_s16, %s699_s15 }
   0x8   : > { %s919_s23 = smov (%p27_p0, %s26_s23), 0  ;;  %p151_p5 = scmp.eq.s32.totalorder %s534_s22, 1 }
   0x9   : > { %p789_p4 = por %p145_p2, %p144_p1  ;;  %s129_s26 = ssub.s32 %s715_s19, %s919_s23 }
   0xa   : > { %p538_p6 = scmp.ge.s32.totalorder %s719_s20, 1  ;;  %p132_p7 = scmp.eq.s32.totalorder %s129_s26, 0 }
   0xb   : > { %p796_p8 = por %p151_p5, %p150_p3  ;;  %p197_p9 = scmp.lt.s32.totalorder %s719_s20, 3 }
   0xc   : > { %s802_s28 = scalar_select %p132_p7, %s707_s17, %s134_s24  }
   0xd   : > { %p198_p10 = pnand %p538_p6, %p197_p9 }
   0xe   : > { %v257_v0 = vld [vmem:[%s907_s1] sm:$0xf] (!%p198_p10)  ;;  %vm290_vm0 = vcmask (!%p198_p10), 1043456   ;;  %p233_p11 = scmp.lt.s32.totalorder (!%p198_p10), %s711_s18, 1  ;;  %vm265_vm1 = vcmask (!%p198_p10), 31744   ;;  %s229_s10 = sand.u32 (!%p198_p10), 1, %s703_s16  }
   0xf   : > { %201 = sbr.rel (%p198_p10) target bundleno = 265 (0x109), region = 36  ;;  %568 = vmatprep.subr.msk.mxu0 (!%p198_p10), %vm290_vm0, %v257_v0  ;;  %582 = vmatprep.subr.msk.mxu1 (!%p198_p10), %vm290_vm0, %v257_v0  ;;  %v542_v9 = vld [vmem:[%s908_s2] ss:$0 sm:$0xff] (!%p198_p10)  ;;  %s539_s13 = sshll.u32 (!%p198_p10), %s229_s10, 6  ;;  %v400_v11 = vld [vmem:[%s909_s3 + $0x8] sm:$0xff] (!%p198_p10)  ;;  %v402_v27 = vld [vmem:[%s909_s3 + $0x18] sm:$0xff] (!%p198_p10) }
  0x10   : > { %569 = vmatpush3.msk.msra.mxu0 (!%p198_p10), %vm290_vm0, %v257_v0  ;;  %583 = vmatpush3.msk.msra.mxu1 (!%p198_p10), %vm290_vm0, %v257_v0  ;;  %v404_v13 = vld [vmem:[%s909_s3 + $0x28] sm:$0xff] (!%p198_p10)  ;;  %v399_v17 = vld [vmem:[%s909_s3] sm:$0xff] (!%p198_p10)  ;;  %v406_v29 = vld [vmem:[%s909_s3 + $0x38] sm:$0xff] (!%p198_p10)  ;;  %s558_s11 = sshll.u32 (!%p198_p10), %s711_s18, 10  ;;  %s231_s12 = scalar_lea.vmem (!%p198_p10), [#allocation2], %s539_s13 }
  0x11   : > { %v403_v19 = vld [vmem:[%s909_s3 + $0x20] sm:$0xff] (!%p198_p10)  ;;  %s439_s14 = sshll.u32 (!%p198_p10), %s231_s12, 4  ;;  %v401_v33 = vld [vmem:[%s909_s3 + $0x10] sm:$0xff] (!%p198_p10)  ;;  %s854_s29 = scalar_lea.hbm (!%p198_p10), %s910_s4, %s558_s11  ;;  %s856_s14 = int_to_ptr.vmem [resolvable:$true] %s439_s14 }
  0x12   : > { %v405_v35 = vld [vmem:[%s909_s3 + $0x30] sm:$0xff] (!%p198_p10)  ;;  %s860_s30 = scalar_lea.sflag (!%p198_p10), [#allocation3], %s229_s10 }
  0x16   : > { %s234_s5 = scalar_select %p233_p11, %s711_s18, 1 }
  0x18   : > { %s557_s6 = sshll.u32 %s234_s5, 6  ;;  %s641_s5 = scalar_lea.vmem %s856_s14, 1024 }
  0x19   : > { %s240_s9 = scalar_lea.vmem %s906_s0, %s557_s6  ;;  %p642_p12 = scmp.ne.s32.totalorder %s856_s14, %s641_s5 }
  0x1a   : > { %v249_v1 = vld [vmem:[%s240_s9] sm:$0xff]  ;;  %v250_v3 = vld [vmem:[%s240_s9 + $0x8] sm:$0xff]  ;;  %v251_v5 = vld [vmem:[%s240_s9 + $0x10] sm:$0xff]  ;;  %s721_s6 = smov [#allocation2]  }
  0x1b   : > { %v253_v2 = vld [vmem:[%s240_s9 + $0x20] sm:$0xff]  ;;  %570 = vmatprep.mubr.msk.f32.mxu0 %vm265_vm1, %v249_v1  ;;  %v254_v4 = vld [vmem:[%s240_s9 + $0x28] sm:$0xff]  ;;  %v255_v6 = vld [vmem:[%s240_s9 + $0x30] sm:$0xff]  ;;  %p643_p13 = pnand %p642_p12, %p789_p4  ;;  %s645_s7 = sshll.u32 %s721_s6, 4  ;;  %s646_s7 = int_to_ptr.vmem [resolvable:$false] %s645_s7 }
  0x1c   : > { %576 = vmatprep.mubr.msk.f32.mxu1 %vm265_vm1, %v253_v2  ;;  %571 = vmatmul.mubr.msk.f32.vlgmr.msra.gmra.mrb[0].mxu0 %vm265_vm1, %v250_v3  ;;  %v252_v7 = vld [vmem:[%s240_s9 + $0x18] sm:$0xff]  ;;  %s647_s8 = scalar_lea.vmem %s646_s7, 2048  ;;  %p648_p1 = scmp.lt.s32.totalorder %s856_s14, %s646_s7 }
  0x1d   : > { %577 = vmatmul.mubr.msk.f32.vlgmr.msra.gmra.mrb[0].mxu1 %vm265_vm1, %v254_v4  ;;  %573 = vmatprep.mubr.msk.f32.mxu0 %vm265_vm1, %v251_v5  ;;  %v256_v8 = vld [vmem:[%s240_s9 + $0x38] sm:$0xff]  ;;  %p644_p0 = pneg %p643_p13  ;;  %p649_p2 = scmp.lt.s32.totalorder %s647_s8, %s641_s5 }
  0x1e   : > { %579 = vmatprep.mubr.msk.f32.mxu1 %vm265_vm1, %v255_v6 }
  0x1f   : > { %p650_p3 = por %p649_p2, %p648_p1 }
  0x20   : > { %574 = vmatmul.mubr.msk.f32.gmra.mrb[2].mxu0 %vm265_vm1, %v252_v7 }
  0x21   : > { %580 = vmatmul.mubr.msk.f32.gmra.mrb[2].mxu1 %vm265_vm1, %v256_v8  ;;  %p651_p5 = pnand %p650_p3, %p644_p0 }
  0xef   : > { %v572_v10 = vpop.f32.mrb[0].mxu0 }
  0xf0   : > { %v578_v12 = vpop.f32.mrb[0].mxu1  ;;  %v366_v14 = vadd.f32 %v572_v10, %v542_v9  ;;  %v360_v16 = vpop.f32.mrb[1].mxu0 }
  0xf1   : > { %v386_v15 = vadd.f32 %v578_v12, %v542_v9  ;;  %v380_v18 = vpop.f32.mrb[1].mxu1  ;;  %v361_v20 = vadd.f32 %v542_v9, %v360_v16 }
  0xf2   : > { %v381_v21 = vadd.f32 %v542_v9, %v380_v18  ;;  %v408_v22 = vadd.f32 %v400_v11, %v366_v14 }
  0xf3   : > { %v412_v23 = vadd.f32 %v404_v13, %v386_v15  ;;  %v407_v24 = vadd.f32 %v399_v17, %v361_v20  ;;  %v575_v26 = vpop.f32.mrb[2].mxu0 }
  0xf4   : > { %v411_v25 = vadd.f32 %v403_v19, %v381_v21  ;;  %v581_v28 = vpop.f32.mrb[2].mxu1  ;;  %416 = vst [vmem:[%s231_s12 + $0x8] sm:$0xff] %v408_v22  ;;  %v376_v30 = vadd.f32 %v575_v26, %v542_v9  ;;  %v370_v32 = vpop.f32.mrb[3].mxu0 }
  0xf5   : > { %420 = vst [vmem:[%s231_s12 + $0x28] sm:$0xff] %v412_v23  ;;  %v396_v31 = vadd.f32 %v581_v28, %v542_v9  ;;  %v390_v34 = vpop.f32.mrb[3].mxu1  ;;  %415 = vst [vmem:[%s231_s12] sm:$0xff] %v407_v24  ;;  %v371_v36 = vadd.f32 %v542_v9, %v370_v32 }
  0xf6   : > { %419 = vst [vmem:[%s231_s12 + $0x20] sm:$0xff] %v411_v25  ;;  %v391_v37 = vadd.f32 %v542_v9, %v390_v34  ;;  %v410_v38 = vadd.f32 %v402_v27, %v376_v30 }
  0xf7   : > { %v414_v39 = vadd.f32 %v406_v29, %v396_v31  ;;  %v409_v40 = vadd.f32 %v401_v33, %v371_v36 }
  0xf8   : > { %v413_v41 = vadd.f32 %v405_v35, %v391_v37  ;;  %418 = vst [vmem:[%s231_s12 + $0x18] sm:$0xff] %v410_v38 }
  0xf9   : > { %422 = vst [vmem:[%s231_s12 + $0x38] sm:$0xff] %v414_v39  ;;  %417 = vst [vmem:[%s231_s12 + $0x10] sm:$0xff] %v409_v40 }
  0xfa   : > { %421 = vst [vmem:[%s231_s12 + $0x30] sm:$0xff] %v413_v41 }
  0xfb   : > { %654 = shalt.err (!%p651_p5)
}
  0xfc   : > { %s655_s10 = scalar_lea.hbm %s854_s29, 1024  ;;  %s659_s12 = scalar_lea.hbm %s910_s4, 2048 }
  0xfd   : > { %p656_p6 = scmp.ne.s32.totalorder %s854_s29, %s655_s10  ;;  %p660_p10 = scmp.lt.u32.totalorder %s854_s29, %s910_s4 }
  0xfe   : > { %p661_p11 = scmp.lt.u32.totalorder %s659_s12, %s655_s10  ;;  %p663_p13 = scmp.lt.u32.totalorder %s655_s10, %s854_s29 }
  0xff   : > { %p657_p7 = pnand %p656_p6, %p789_p4 }
 0x100   : > { %p662_p12 = por %p661_p11, %p660_p10 }
 0x101   : > { %p658_p9 = pneg %p657_p7 }
 0x102   : > { %p664_p0 = por %p663_p13, %p662_p12 }
 0x104   : > { %p665_p1 = pnand %p664_p0, %p658_p9 }
 0x106   : > { %668 = shalt.err (!%p665_p1)
}
 0x107   : > { %s722_s24 = smov 128   ;;  %s723_s26 = smov 8  }
 0x108   : > { %584 = dma.vmem_to_hbm [thread:$0]  (%p789_p4), %s856_s14, 1024, %s854_s29, %s860_s30, %s722_s24, %s722_s24, %s723_s26  }
 0x109 PF: > { %p590_p2 = scmp.ge.s32.totalorder %s719_s20, 2  ;;  %s454_s18 = sand.u32 1, %s699_s15  }
 0x10a   : > { %s455_s13 = scalar_lea.sflag [#allocation3], %s454_s18 }
 0x10b   : > { %p587_p3 = pnand %p590_p2, %p796_p8 }
 0x10d   : > { %694 = dma.done.wait (!%p587_p3), %s455_s13, 1024  }
 0x10e   : > { %696 = vsyncadd (!%p587_p3), %s455_s13, 4294966272  ;;  %s17_s20 = sadd.s32 1, %s719_s20   ;;  %s913_s15 = smov %s703_s16 }
 0x10f   : > { %p14_p5 = scmp.ge.s32.totalorder %s17_s20, 4   ;;  %s914_s16 = smov %s707_s17 }
 0x110   : > { %s915_s17 = smov %s802_s28  ;;  %s916_s18 = smov %s715_s19 }
 0x111   : > { %s917_s19 = smov %s919_s23  ;;  %16 = sbr.rel (!%p14_p5) target bundleno = 4 (0x4), region = 74 }
 0x118   :  { %460 = vsyncpa [#allocation3], 1 }
 0x119   :  { %462 = vsyncpa [#allocation3 + $0x1], 1 }

</bundles_post_ra>
